<compile_context>
chip_gen: v5e
topology: v5e:2x2
jax: 0.10.0
libtpu: 0.0.40
codegen_flags: <defaults>
</compile_context>

<pallas_src>
import functools

import jax
import jax.numpy as jnp
from jax.experimental import pallas as pl
from jax.experimental.pallas import tpu as pltpu

# ----------------------------- model config ---------------------------------
CONFIG = dict(
    num_users=64,
    num_items=128,
    num_factors=32,
    norm_user=True,
    norm_item=True,
    multiplier=2.0,
    bias=0.1,
    use_user_bias=True,
    use_item_bias=True,
)

_EPS = 1e-12  # F.normalize default eps


def _round_up(x, m):
    return ((x + m - 1) // m) * m


# ------------------------------ Pallas kernel -------------------------------
def _basemf_kernel(*refs, norm_user, norm_item, multiplier, bias, has_bias):
    if has_bias:
        fu_ref, fi_ref, b_ref, out_ref = refs
    else:
        fu_ref, fi_ref, out_ref = refs

    # fu/fi: (D, TB) -- factor dim on sublanes, batch on lanes.
    fu = fu_ref[...]
    fi = fi_ref[...]

    # Row-wise dot product -> lane-dense (1, TB).  Sublane reduce -> XLU slot.
    sim = jnp.sum(fu * fi, axis=0, keepdims=True)

    # Fused L2 normalization via rsqrt (EUP): x / max(||x||, eps) applied to the
    # dot product as * rsqrt(max(||x||^2, eps^2)).  With both norms enabled the
    # two rsqrt's fuse into one (product of the clamped sums-of-squares).
    if norm_user and norm_item:
        su = jnp.maximum(jnp.sum(fu * fu, axis=0, keepdims=True), _EPS * _EPS)
        si = jnp.maximum(jnp.sum(fi * fi, axis=0, keepdims=True), _EPS * _EPS)
        sim = sim * jax.lax.rsqrt(su * si)
    elif norm_user:
        su = jnp.maximum(jnp.sum(fu * fu, axis=0, keepdims=True), _EPS * _EPS)
        sim = sim * jax.lax.rsqrt(su)
    elif norm_item:
        si = jnp.maximum(jnp.sum(fi * fi, axis=0, keepdims=True), _EPS * _EPS)
        sim = sim * jax.lax.rsqrt(si)

    # Combined (user + item) bias row, already lane-dense (1, TB).
    if has_bias:
        sim = sim + b_ref[...]

    out_ref[...] = (sim * multiplier + bias).astype(out_ref.dtype)


def basemf_forward(f_user, f_item, user_b, item_b, *, config, tile_b=None):
    """f_user/f_item: (B, D) float32; user_b/item_b: (B, 1) float32 -> (B, 1)."""
    B, D = f_user.shape
    has_bias = bool(config['use_user_bias'] or config['use_item_bias'])

    # Lane tile: whole (padded) batch for tiny B, else large lane-dense blocks.
    if tile_b is None:
        tile_b = min(_round_up(B, 128), 4096)
    tile_b = _round_up(tile_b, 128)
    b_pad = _round_up(B, tile_b)
    pad = b_pad - B

    # --- wrapper-side layout plumbing (glue, no hot-path compute) -----------
    # Transpose so batch is on lanes; zero-pad batch to the tile boundary.
    fu_t = jnp.pad(f_user.astype(jnp.float32).T, ((0, 0), (0, pad)))   # (D, B_pad)
    fi_t = jnp.pad(f_item.astype(jnp.float32).T, ((0, 0), (0, pad)))   # (D, B_pad)

    grid = (b_pad // tile_b,)
    emb_spec = pl.BlockSpec((D, tile_b), lambda i: (0, i))
    row_spec = pl.BlockSpec((1, tile_b), lambda i: (0, i))

    operands = [fu_t, fi_t]
    in_specs = [emb_spec, emb_spec]
    if has_bias:
        # Combined bias row -> one lane-dense operand instead of two (B,1) ones.
        bias_row = jnp.zeros((B,), jnp.float32)
        if config['use_user_bias']:
            bias_row = bias_row + user_b[:, 0].astype(jnp.float32)
        if config['use_item_bias']:
            bias_row = bias_row + item_b[:, 0].astype(jnp.float32)
        operands.append(jnp.pad(bias_row, (0, pad)).reshape(1, b_pad))
        in_specs.append(row_spec)

    kernel = functools.partial(
        _basemf_kernel,
        norm_user=bool(config['norm_user']),
        norm_item=bool(config['norm_item']),
        multiplier=float(config['multiplier']),
        bias=float(config['bias']),
        has_bias=has_bias,
    )

    out = pl.pallas_call(
        kernel,
        out_shape=jax.ShapeDtypeStruct((1, b_pad), jnp.float32),
        grid=grid,
        in_specs=in_specs,
        out_specs=row_spec,
        compiler_params=pltpu.CompilerParams(
            dimension_semantics=("parallel",)),
    )(*operands)

    # Drop batch padding and restore the PyTorch (B, 1) shape.
    return out[0, :B].reshape(B, 1)


# ------------------------------ reference -----------------------------------
def basemf_reference(f_user, f_item, user_b, item_b, *, config):
    fu, fi = f_user, f_item
    if config['norm_user']:
        fu = fu / jnp.maximum(jnp.linalg.norm(fu, axis=1, keepdims=True), _EPS)
    if config['norm_item']:
        fi = fi / jnp.maximum(jnp.linalg.norm(fi, axis=1, keepdims=True), _EPS)
    sim = jnp.sum(fu * fi, axis=1, keepdims=True)
    if config['use_user_bias']:
        sim = sim + user_b
    if config['use_item_bias']:
        sim = sim + item_b
    return sim * config['multiplier'] + config['bias']


# -------------------------------- driver ------------------------------------
if __name__ == "__main__":
    key = jax.random.PRNGKey(0)
    k_ue, k_ie, k_ub, k_ib, k_u, k_i = jax.random.split(key, 6)

    U = CONFIG['num_users']
    I = CONFIG['num_items']
    D = CONFIG['num_factors']
    B = 16  # batch of (user, item) pairs

    # Deterministic parameter init (nn.Embedding default ~ N(0, 1)).
    user_embedding = jax.random.normal(k_ue, (U, D), dtype=jnp.float32)
    item_embedding = jax.random.normal(k_ie, (I, D), dtype=jnp.float32)
    user_bias_tbl = jax.random.normal(k_ub, (U, 1), dtype=jnp.float32)
    item_bias_tbl = jax.random.normal(k_ib, (I, 1), dtype=jnp.float32)

    users = jax.random.randint(k_u, (B,), 0, U)
    items = jax.random.randint(k_i, (B,), 0, I)

    # Embedding gather is glue (plain JAX); the normalize / dot / bias / scale
    # hot path runs inside the Pallas kernel.
    f_user = jnp.take(user_embedding, users, axis=0)     # (B, D)
    f_item = jnp.take(item_embedding, items, axis=0)     # (B, D)
    u_b = jnp.take(user_bias_tbl, users, axis=0)          # (B, 1)
    i_b = jnp.take(item_bias_tbl, items, axis=0)          # (B, 1)

    out = basemf_forward(f_user, f_item, u_b, i_b, config=CONFIG)
    out = jax.block_until_ready(out)

    ref = basemf_reference(f_user, f_item, u_b, i_b, config=CONFIG)
    assert out.shape == (B, 1)
    assert jnp.allclose(out, ref, atol=1e-5, rtol=1e-5), (
        f"mismatch: max abs err = {jnp.max(jnp.abs(out - ref))}")

    print("KERNEL_OK")
</pallas_src>

<mosaic_0001>
module attributes {stable_mosaic.version = 11 : i64} {
  func.func @_basemf_kernel(%arg0: i32, %arg1: memref<32x128xf32, #tpu.memory_space<vmem>>, %arg2: memref<32x128xf32, #tpu.memory_space<vmem>>, %arg3: memref<1x128xf32, #tpu.memory_space<vmem>>, %arg4: memref<1x128xf32, #tpu.memory_space<vmem>>) attributes {dimension_semantics = [#tpu.dimension_semantics<parallel>], iteration_bounds = array<i64: 1>, scalar_prefetch = 0 : i64, scratch_operands = 0 : i64, tpu.core_type = #tpu.core_type<tc>, window_params = [{transform_indices = @transform_0, window_bounds = array<i64: 32, 128>}, {transform_indices = @transform_1, window_bounds = array<i64: 32, 128>}, {transform_indices = @transform_2, window_bounds = array<i64: 1, 128>}, {transform_indices = @transform_3, window_bounds = array<i64: 1, 128>}]} {
    %c0 = arith.constant 0 : index
    %c0_0 = arith.constant 0 : index
    %0 = vector.load %arg1[%c0, %c0_0] : memref<32x128xf32, #tpu.memory_space<vmem>>, vector<32x128xf32>
    %c0_1 = arith.constant 0 : index
    %c0_2 = arith.constant 0 : index
    %1 = vector.load %arg2[%c0_1, %c0_2] : memref<32x128xf32, #tpu.memory_space<vmem>>, vector<32x128xf32>
    %2 = arith.mulf %0, %1 : vector<32x128xf32>
    %cst = arith.constant dense<0.000000e+00> : vector<128xf32>
    %3 = vector.multi_reduction <add>, %2, %cst [0] : vector<32x128xf32> to vector<128xf32>
    %4 = vector.shape_cast %3 : vector<128xf32> to vector<1x128xf32>
    %5 = arith.mulf %0, %0 : vector<32x128xf32>
    %cst_3 = arith.constant dense<0.000000e+00> : vector<128xf32>
    %6 = vector.multi_reduction <add>, %5, %cst_3 [0] : vector<32x128xf32> to vector<128xf32>
    %7 = vector.shape_cast %6 : vector<128xf32> to vector<1x128xf32>
    %cst_4 = arith.constant 1.000000e-24 : f32
    %8 = vector.broadcast %cst_4 : f32 to vector<1x128xf32>
    %9 = arith.maximumf %7, %8 : vector<1x128xf32>
    %10 = arith.mulf %1, %1 : vector<32x128xf32>
    %cst_5 = arith.constant dense<0.000000e+00> : vector<128xf32>
    %11 = vector.multi_reduction <add>, %10, %cst_5 [0] : vector<32x128xf32> to vector<128xf32>
    %12 = vector.shape_cast %11 : vector<128xf32> to vector<1x128xf32>
    %cst_6 = arith.constant 1.000000e-24 : f32
    %13 = vector.broadcast %cst_6 : f32 to vector<1x128xf32>
    %14 = arith.maximumf %12, %13 : vector<1x128xf32>
    %15 = arith.mulf %9, %14 : vector<1x128xf32>
    %16 = math.rsqrt %15 : vector<1x128xf32>
    %17 = arith.mulf %4, %16 : vector<1x128xf32>
    %c0_7 = arith.constant 0 : index
    %c0_8 = arith.constant 0 : index
    %18 = vector.load %arg3[%c0_7, %c0_8] : memref<1x128xf32, #tpu.memory_space<vmem>>, vector<1x128xf32>
    %19 = arith.addf %17, %18 : vector<1x128xf32>
    %cst_9 = arith.constant 2.000000e+00 : f32
    %20 = vector.broadcast %cst_9 : f32 to vector<1x128xf32>
    %21 = arith.mulf %19, %20 : vector<1x128xf32>
    %cst_10 = arith.constant 1.000000e-01 : f32
    %22 = vector.broadcast %cst_10 : f32 to vector<1x128xf32>
    %23 = arith.addf %21, %22 : vector<1x128xf32>
    %c0_11 = arith.constant 0 : index
    %c0_12 = arith.constant 0 : index
    %24 = vector.load %arg4[%c0_11, %c0_12] : memref<1x128xf32, #tpu.memory_space<vmem>>, vector<1x128xf32>
    tpu.vector_store %arg4[%c0_11, %c0_12], %23 {strides = array<i32>} : memref<1x128xf32, #tpu.memory_space<vmem>>, vector<1x128xf32>,
    return
  }
  func.func @transform_0(%arg0: i32) -> (i32, i32) {
    %c0_i32 = arith.constant 0 : i32
    %c0_i32_0 = arith.constant 0 : i32
    return %c0_i32, %arg0 : i32, i32
  }
  func.func @transform_1(%arg0: i32) -> (i32, i32) {
    %c0_i32 = arith.constant 0 : i32
    %c0_i32_0 = arith.constant 0 : i32
    return %c0_i32, %arg0 : i32, i32
  }
  func.func @transform_2(%arg0: i32) -> (i32, i32) {
    %c0_i32 = arith.constant 0 : i32
    %c0_i32_0 = arith.constant 0 : i32
    return %c0_i32, %arg0 : i32, i32
  }
  func.func @transform_3(%arg0: i32) -> (i32, i32) {
    %c0_i32 = arith.constant 0 : i32
    %c0_i32_0 = arith.constant 0 : i32
    return %c0_i32, %arg0 : i32, i32
  }
}

</mosaic_0001>

<bundles_post_ra>
// kernel: tpu_custom_call.1
= control target key start
LH: loop header
LB: loop body
LE: loop exit
PB: predicated region body
PF: predicated region fallthrough
CT: control target
= control target key end

     0   :  { %8 = vsyncpa [#allocation3], 0  ;;  %s253_s0 = inlined_call_operand.hbm [shape: f32[32,128], index: 0, kind: input, shape index: {}]   ;;  %s254_s1 = inlined_call_operand.hbm [shape: f32[32,128], index: 1, kind: input, shape index: {}]   ;;  %s255_s2 = inlined_call_operand.vmem [shape: f32[1,128], index: 2, kind: input, shape index: {}]   ;;  %s256_s3 = inlined_call_operand.hbm [shape: f32[1,128], index: 3, kind: output, shape index: {}]  }
   0x1   :  { %9 = vsyncpa [#allocation6], 0 }
   0x2   :  { %10 = vsyncpa [#allocation4], 0  ;;  %s15_s14 = sshll.u32 %s253_s0, 4  ;;  %s216_s15 = smov [#allocation2]   ;;  %s16_s14 = int_to_ptr.hbm [resolvable:$true] %s15_s14 }
   0x3   :  { %s17_s16 = sshll.u32 %s216_s15, 4  ;;  %s28_s19 = sshll.u32 %s254_s1, 4  ;;  %s18_s16 = int_to_ptr.vmem [resolvable:$true] %s17_s16  ;;  %s29_s19 = int_to_ptr.hbm [resolvable:$true] %s28_s19 }
   0x4   :  { %s217_s20 = smov 128   ;;  %s218_s21 = smov 8  }
   0x5   :  { %23 = dma.hbm_to_vmem [thread:$0]  %s16_s14, 512, %s18_s16, [#allocation3], %s217_s20, %s217_s20, %s218_s21  }
   0x6   :  { %s219_s22 = smov [#allocation5]  }
   0x7   :  { %s30_s23 = sshll.u32 %s219_s22, 4  ;;  %s31_s23 = int_to_ptr.vmem [resolvable:$true] %s30_s23 }
   0x8   :  { %36 = dma.hbm_to_vmem [thread:$0]  %s29_s19, 512, %s31_s23, [#allocation6], %s217_s20, %s217_s20, %s218_s21  }
   0x9   :  { %210 = dma.done.wait [#allocation3], 512  }
   0xa   :  { %211 = vsyncadd [#allocation3], 4294966784 }
   0xb   :  { %212 = dma.done.wait [#allocation6], 512  }
   0xc   :  { %213 = vsyncadd [#allocation6], 4294966784  ;;  %v47_v0 = vld [vmem:[#allocation2] sm:$0xff]  ;;  %v48_v1 = vld [vmem:[#allocation2 + $0x8] sm:$0xff]  ;;  %s220_s24 = smov [#allocation7]   ;;  %s120_s28 = sshll.u32 %s256_s3, 4  ;;  %s121_s28 = int_to_ptr.hbm [resolvable:$true] %s120_s28 }
   0xd   :  { %v49_v2 = vld [vmem:[#allocation2 + $0x10] sm:$0xff]  ;;  %v50_v3 = vld [vmem:[#allocation2 + $0x18] sm:$0xff]  ;;  %v51_v4 = vld [vmem:[#allocation5] sm:$0xff]  ;;  %v68_v6 = vmul.f32 %v47_v0, %v47_v0  ;;  %v69_v7 = vmul.f32 %v48_v1, %v48_v1  ;;  %s118_s25 = sshll.u32 %s220_s24, 4  ;;  %s119_s25 = int_to_ptr.vmem [resolvable:$true] %s118_s25 }
   0xe   :  { %v52_v5 = vld [vmem:[#allocation5 + $0x8] sm:$0xff]  ;;  %v70_v8 = vmul.f32 %v49_v2, %v49_v2  ;;  %v53_v9 = vld [vmem:[#allocation5 + $0x10] sm:$0xff]  ;;  %v54_v10 = vld [vmem:[#allocation5 + $0x18] sm:$0xff]  ;;  %v82_v11 = vmul.f32 %v51_v4, %v51_v4  ;;  %v71_v12 = vmul.f32 %v50_v3, %v50_v3  ;;  %v55_v15 = vmul.f32 %v51_v4, %v47_v0 }
   0xf   :  { %v72_v13 = vadd.f32 %v69_v7, %v68_v6  ;;  %v83_v14 = vmul.f32 %v52_v5, %v52_v5  ;;  %v84_v16 = vmul.f32 %v53_v9, %v53_v9  ;;  %v56_v17 = vmul.f32 %v52_v5, %v48_v1  ;;  %v108_v57 = vld [vmem:[%s255_s2] sm:$0x1] }
  0x10   :  { %v85_v19 = vmul.f32 %v54_v10, %v54_v10  ;;  %v57_v23 = vmul.f32 %v53_v9, %v49_v2  ;;  %v58_v29 = vmul.f32 %v54_v10, %v50_v3 }
  0x11   :  { %v73_v18 = vadd.f32 %v72_v13, %v70_v8  ;;  %v86_v20 = vadd.f32 %v83_v14, %v82_v11  ;;  %v59_v24 = vadd.f32 %v56_v17, %v55_v15 }
  0x13   :  { %v74_v21 = vadd.f32 %v73_v18, %v71_v12  ;;  %v87_v22 = vadd.f32 %v86_v20, %v84_v16  ;;  %v60_v30 = vadd.f32 %v59_v24, %v57_v23 }
  0x15   :  { %v75_v25 = vrot.slane %v74_v21, 4  ;;  %v88_v26 = vadd.f32 %v87_v22, %v85_v19  ;;  %v61_v35 = vadd.f32 %v60_v30, %v58_v29 }
  0x17   :  { %v76_v27 = vadd.f32 %v75_v25, %v74_v21  ;;  %v89_v28 = vrot.slane %v88_v26, 4  ;;  %v62_v40 = vrot.slane %v61_v35, 4 }
  0x19   :  { %v77_v31 = vrot.slane %v76_v27, 2  ;;  %v90_v32 = vadd.f32 %v89_v28, %v88_v26  ;;  %v63_v44 = vadd.f32 %v62_v40, %v61_v35 }
  0x1b   :  { %v78_v33 = vadd.f32 %v77_v31, %v76_v27  ;;  %v91_v34 = vrot.slane %v90_v32, 2  ;;  %v64_v46 = vrot.slane %v63_v44, 2 }
  0x1d   :  { %v79_v36 = vrot.slane %v78_v33, 1  ;;  %v92_v37 = vadd.f32 %v91_v34, %v90_v32  ;;  %v65_v48 = vadd.f32 %v64_v46, %v63_v44 }
  0x1f   :  { %v80_v38 = vadd.f32 %v79_v36, %v78_v33  ;;  %v93_v39 = vrot.slane %v92_v37, 1  ;;  %v66_v51 = vrot.slane %v65_v48, 1 }
  0x21   :  { %v81_v41 = vmax.f32 %v80_v38, 1e-24  ;;  %v94_v42 = vadd.f32 %v93_v39, %v92_v37  ;;  %v67_v54 = vadd.f32 %v66_v51, %v65_v48 }
  0x23   :  { %v95_v43 = vmax.f32 %v94_v42, 1e-24 }
  0x25   :  { %v96_v45 = vmul.f32 %v95_v43, %v81_v41 }
  0x27   :  { %136 = vrsqrt.f32 %v96_v45  ;;  %vm103_vm0 = vweird.f32 %v96_v45 }
  0x2d   :  { %v137_v47 = vpop.eup %136 }
  0x2e   :  { %v98_v49 = vmul.f32 %v137_v47, %v96_v45  ;;  %vm104_vm1 = vweird.f32 %v137_v47 }
  0x2f   :  { %vm105_vm2 = vmor %vm103_vm0, %vm104_vm1 }
  0x30   :  { %v99_v50 = vmul.f32 %v137_v47, %v98_v49 }
  0x32   :  { %v100_v52 = vmul.f32 0.5, %v99_v50 }
  0x34   :  { %v101_v53 = vsub.f32 1.5, %v100_v52 }
  0x36   :  { %v102_v55 = vmul.f32 %v137_v47, %v101_v53 }
  0x38   :  { %v106_v56 = vsel %vm105_vm2, %v137_v47, %v102_v55 }
  0x39   :  { %v107_v58 = vmul.f32 %v106_v56, %v67_v54 }
  0x3b   :  { %v109_v59 = vadd.f32 %v108_v57, %v107_v58 }
  0x3d   :  { %v110_v60 = vmul.f32 2.0, %v109_v59 }
  0x3f   :  { %v111_v61 = vadd.f32 0.1, %v110_v60 }
  0x41   :  { %112 = vst [vmem:[#allocation7] sm:$0x1] %v111_v61 }
  0x42   :  { %123 = dma.vmem_to_hbm [thread:$0]  %s119_s25, 16, %s121_s28, [#allocation4]  }
  0x43   :  { %214 = dma.done.wait [#allocation4], 16  }
  0x44   :  { %215 = vsyncadd [#allocation4], 4294967280 }
  0x45   :  { %128 = vsyncpa [#allocation3], 1 }
  0x46   :  { %129 = vsyncpa [#allocation6], 1 }
  0x47   :  { %130 = vsyncpa [#allocation4], 1 }

</bundles_post_ra>
